<compile_context>
chip_gen: v7x
topology: tpu7x:2x2x1
jax: 0.10.0
libtpu: 0.0.40
codegen_flags: <defaults>
</compile_context>

<pallas_src>
import functools

import jax
import jax.numpy as jnp
from jax.experimental import pallas as pl
from jax.experimental.pallas import tpu as pltpu


def _round_up(x, m):
    return ((x + m - 1) // m) * m


# --------------------------------------------------------------------------
# Kernel
# --------------------------------------------------------------------------
def actor_critic_kernel(x_ref, w1_ref, b1_ref, w2_ref, b2_ref,
                        wh_ref, bh_ref, out_ref, *, action_dim):
    # Backbone: Linear -> ReLU -> Linear -> ReLU (bf16 MXU, f32 accumulate).
    x = x_ref[...].astype(jnp.bfloat16)
    h1 = jnp.dot(x, w1_ref[...], preferred_element_type=jnp.float32) + b1_ref[...]
    h1 = jnp.maximum(h1, 0.0)
    h2 = jnp.dot(h1.astype(jnp.bfloat16), w2_ref[...],
                 preferred_element_type=jnp.float32) + b2_ref[...]
    h2 = jnp.maximum(h2, 0.0)

    # Fused head: lanes [0, A) are policy logits, lane A is the value,
    # lanes (A, 128) are zero padding.
    head = jnp.dot(h2.astype(jnp.bfloat16), wh_ref[...],
                   preferred_element_type=jnp.float32) + bh_ref[...]

    lane = jax.lax.broadcasted_iota(jnp.int32, head.shape, 1)
    is_logit = lane < action_dim

    # Max-stabilized softmax over the logit lanes only.
    logits = jnp.where(is_logit, head, -jnp.inf)
    m = jnp.max(logits, axis=-1, keepdims=True)
    e = jnp.exp(logits - m)                       # exp(-inf) == 0 on pad lanes
    denom = jnp.sum(e, axis=-1, keepdims=True)
    inv = pl.reciprocal(denom, approx=True)       # EUP vrcp (free slot)
    inv = inv * (2.0 - denom * inv)               # one Newton step -> ~f32 precision
    prob = e * inv

    # Single lane-dense store: prob | value | zeros.
    out = jnp.where(is_logit, prob,
                    jnp.where(lane == action_dim, head, 0.0))
    out_ref[...] = out.astype(out_ref.dtype)


# --------------------------------------------------------------------------
# One-time parameter preparation (hoisted out of the per-call path)
# --------------------------------------------------------------------------
def prepare_params(params):
    """Build the fused head and cast weights ONCE; returns a dict that can be
    reused for every forward call (avoids per-call XLA prep ops)."""
    state_dim, hidden = params["w1"].shape
    action_dim = params["wp"].shape[1]
    head_pad = _round_up(action_dim + 1, 128)     # lane-dense 128-multiple width

    wh = jnp.zeros((hidden, head_pad), jnp.bfloat16)
    wh = wh.at[:, :action_dim].set(params["wp"].astype(jnp.bfloat16))
    wh = wh.at[:, action_dim:action_dim + 1].set(params["wv"].astype(jnp.bfloat16))
    bh = jnp.zeros((1, head_pad), jnp.float32)
    bh = bh.at[:, :action_dim].set(params["bp"].astype(jnp.float32))
    bh = bh.at[:, action_dim:action_dim + 1].set(params["bv"].astype(jnp.float32))

    prep = dict(
        w1=params["w1"].astype(jnp.bfloat16),
        b1=params["b1"].astype(jnp.float32).reshape(1, hidden),
        w2=params["w2"].astype(jnp.bfloat16),
        b2=params["b2"].astype(jnp.float32).reshape(1, hidden),
        wh=wh, bh=bh,
        state_dim=state_dim, hidden=hidden,
        action_dim=action_dim, head_pad=head_pad,
    )
    # Materialize now so the one-time prep cost is not paid on first forward.
    jax.block_until_ready([prep["w1"], prep["b1"], prep["w2"], prep["b2"],
                           prep["wh"], prep["bh"]])
    return prep


# --------------------------------------------------------------------------
# Batch tiling heuristic
# --------------------------------------------------------------------------
def _choose_tb(B):
    """Tiny B -> single tile (one grid step).  Otherwise an EVEN number of
    >= 2 tiles (both v7x TCs get work; no-op on single-TC v5e/v6e) with tile
    size <= 2048 rows (amortizes per-step overhead + w2 RHS re-push while
    keeping double-buffered tiles well inside VMEM)."""
    bp8 = _round_up(B, 8)
    if bp8 <= 256:
        return bp8
    n = pl.cdiv(bp8, 2048)
    n = max(2, 2 * ((n + 1) // 2))                # even tile count, >= 2
    return _round_up(pl.cdiv(bp8, n), 8)


# --------------------------------------------------------------------------
# Forward wrapper
# --------------------------------------------------------------------------
def actor_critic_forward(state, prep, *, tb=None, out_dtype=jnp.float32):
    """state: [B, state_dim] float32.  prep: output of prepare_params().

    out_dtype=jnp.bfloat16 halves output HBM writeback bytes (useful at large
    B on v6e/v7x) at the cost of ~3 significant digits on prob/value.

    Returns (prob [B, action_dim] f32, value [B, 1] f32)."""
    B, state_dim = state.shape
    assert state_dim == prep["state_dim"]
    hidden = prep["hidden"]
    action_dim = prep["action_dim"]
    head_pad = prep["head_pad"]

    if tb is None:
        tb = _choose_tb(B)
    Bp = _round_up(B, tb)
    if Bp != B:
        state = jnp.pad(state, ((0, Bp - B), (0, 0)))

    grid = (Bp // tb,)
    kernel = functools.partial(actor_critic_kernel, action_dim=action_dim)

    out_itemsize = jnp.dtype(out_dtype).itemsize
    weight_bytes = (state_dim * hidden + hidden * hidden + hidden * head_pad) * 2 \
        + (2 * hidden + head_pad) * 4
    cost = pl.CostEstimate(
        flops=2 * Bp * (state_dim * hidden + hidden * hidden + hidden * head_pad),
        transcendentals=Bp * head_pad,
        bytes_accessed=Bp * state_dim * 4 + weight_bytes + Bp * head_pad * out_itemsize,
    )

    out = pl.pallas_call(
        kernel,
        out_shape=jax.ShapeDtypeStruct((Bp, head_pad), out_dtype),
        grid=grid,
        in_specs=[
            pl.BlockSpec((tb, state_dim), lambda i: (i, 0)),      # state tile
            pl.BlockSpec((state_dim, hidden), lambda i: (0, 0)),  # w1 (resident)
            pl.BlockSpec((1, hidden), lambda i: (0, 0)),          # b1
            pl.BlockSpec((hidden, hidden), lambda i: (0, 0)),     # w2
            pl.BlockSpec((1, hidden), lambda i: (0, 0)),          # b2
            pl.BlockSpec((hidden, head_pad), lambda i: (0, 0)),   # fused head W
            pl.BlockSpec((1, head_pad), lambda i: (0, 0)),        # fused head b
        ],
        out_specs=pl.BlockSpec((tb, head_pad), lambda i: (i, 0)),
        compiler_params=pltpu.CompilerParams(
            dimension_semantics=("parallel",),        # shard batch tiles across TCs
            vmem_limit_bytes=32 * 1024 * 1024,
        ),
        cost_estimate=cost,
    )(state, prep["w1"], prep["b1"], prep["w2"], prep["b2"],
      prep["wh"], prep["bh"])

    prob = out[:B, :action_dim].astype(jnp.float32)
    value = out[:B, action_dim:action_dim + 1].astype(jnp.float32)
    return prob, value


# --------------------------------------------------------------------------
# Init + pure-JAX reference
# --------------------------------------------------------------------------
def init_params(key, state_dim, action_dim, hidden=256):
    """Init mimicking nn.Linear's U(-1/sqrt(fan_in), 1/sqrt(fan_in)).
    Weights are [in, out] (transposed vs. PyTorch)."""
    ks = jax.random.split(key, 8)

    def linear(kw, kb, fan_in, fan_out):
        bound = 1.0 / jnp.sqrt(fan_in)
        w = jax.random.uniform(kw, (fan_in, fan_out), jnp.float32, -bound, bound)
        b = jax.random.uniform(kb, (1, fan_out), jnp.float32, -bound, bound)
        return w.astype(jnp.bfloat16), b

    w1, b1 = linear(ks[0], ks[1], state_dim, hidden)
    w2, b2 = linear(ks[2], ks[3], hidden, hidden)
    wp, bp = linear(ks[4], ks[5], hidden, action_dim)
    wv, bv = linear(ks[6], ks[7], hidden, 1)
    return dict(w1=w1, b1=b1, w2=w2, b2=b2, wp=wp, bp=bp, wv=wv, bv=bv)


def reference_forward(state, p):
    """Pure-JAX reference using the same bf16-weight / f32-accumulate recipe."""
    def mm(x, w):
        return jnp.dot(x.astype(jnp.bfloat16), w.astype(jnp.bfloat16),
                       preferred_element_type=jnp.float32)

    h = jnp.maximum(mm(state, p["w1"]) + p["b1"], 0.0)
    h = jnp.maximum(mm(h, p["w2"]) + p["b2"], 0.0)
    logits = mm(h, p["wp"]) + p["bp"]
    prob = jax.nn.softmax(logits, axis=-1)
    value = mm(h, p["wv"]) + p["bv"]
    return prob, value


# --------------------------------------------------------------------------
# Self-test
# --------------------------------------------------------------------------
if __name__ == "__main__":
    key = jax.random.PRNGKey(0)
    k_state, k_params, k_state2, k_state3 = jax.random.split(key, 4)

    B, state_dim, action_dim = 8, 16, 8
    params = init_params(k_params, state_dim, action_dim)
    prep = prepare_params(params)       # one-time fused-head / cast prep

    # 1) Tiny batch: single-tile path.
    state = jax.random.normal(k_state, (B, state_dim), jnp.float32)
    prob, value = actor_critic_forward(state, prep)
    jax.block_until_ready((prob, value))

    prob_ref, value_ref = reference_forward(state, params)
    assert prob.shape == (B, action_dim) and value.shape == (B, 1)
    assert jnp.allclose(prob, prob_ref, atol=1e-4, rtol=1e-4)
    assert jnp.allclose(value, value_ref, atol=1e-4, rtol=1e-4)
    assert jnp.allclose(jnp.sum(prob, axis=-1), 1.0, atol=1e-5)

    # 2) Explicit small tile: multi-step grid + batch-row padding.
    B2 = 20
    state2 = jax.random.normal(k_state2, (B2, state_dim), jnp.float32)
    prob2, value2 = actor_critic_forward(state2, prep, tb=8)   # 3 grid steps
    jax.block_until_ready((prob2, value2))
    prob2_ref, value2_ref = reference_forward(state2, params)
    assert prob2.shape == (B2, action_dim) and value2.shape == (B2, 1)
    assert jnp.allclose(prob2, prob2_ref, atol=1e-4, rtol=1e-4)
    assert jnp.allclose(value2, value2_ref, atol=1e-4, rtol=1e-4)
    assert jnp.allclose(jnp.sum(prob2, axis=-1), 1.0, atol=1e-5)

    # 3) Mid-size batch: default heuristic -> 2 even tiles (+ pad rows).
    B3 = 300
    state3 = jax.random.normal(k_state3, (B3, state_dim), jnp.float32)
    prob3, value3 = actor_critic_forward(state3, prep)         # 2 tiles of 152
    jax.block_until_ready((prob3, value3))
    prob3_ref, value3_ref = reference_forward(state3, params)
    assert prob3.shape == (B3, action_dim) and value3.shape == (B3, 1)
    assert jnp.allclose(prob3, prob3_ref, atol=1e-4, rtol=1e-4)
    assert jnp.allclose(value3, value3_ref, atol=1e-4, rtol=1e-4)
    assert jnp.allclose(jnp.sum(prob3, axis=-1), 1.0, atol=1e-5)

    # 4) Optional reduced-writeback bf16 output path (looser tolerance —
    #    deliberate precision tradeoff for the writeback-bound large-B regime).
    prob4, value4 = actor_critic_forward(state3, prep, out_dtype=jnp.bfloat16)
    jax.block_until_ready((prob4, value4))
    assert jnp.allclose(prob4, prob3_ref, atol=2e-2, rtol=2e-2)
    assert jnp.allclose(value4, value3_ref, atol=2e-2, rtol=2e-2)
    assert jnp.allclose(jnp.sum(prob4, axis=-1), 1.0, atol=2e-2)

    print("KERNEL_OK")
</pallas_src>

<mosaic_0001>
module attributes {stable_mosaic.version = 11 : i64} {
  func.func @actor_critic_kernel(%arg0: i32, %arg1: memref<8x16xf32, #tpu.memory_space<vmem>>, %arg2: memref<16x256xbf16, #tpu.memory_space<vmem>>, %arg3: memref<1x256xf32, #tpu.memory_space<vmem>>, %arg4: memref<256x256xbf16, #tpu.memory_space<vmem>>, %arg5: memref<1x256xf32, #tpu.memory_space<vmem>>, %arg6: memref<256x128xbf16, #tpu.memory_space<vmem>>, %arg7: memref<1x128xf32, #tpu.memory_space<vmem>>, %arg8: memref<8x128xf32, #tpu.memory_space<vmem>>) attributes {dimension_semantics = [#tpu.dimension_semantics<parallel>], iteration_bounds = array<i64: 1>, scalar_prefetch = 0 : i64, scratch_operands = 0 : i64, tpu.core_type = #tpu.core_type<tc>, window_params = [{transform_indices = @transform_0, window_bounds = array<i64: 8, 16>}, {pipeline_mode = #tpu.pipeline_mode<synchronous>, transform_indices = @transform_1, window_bounds = array<i64: 16, 256>}, {pipeline_mode = #tpu.pipeline_mode<synchronous>, transform_indices = @transform_2, window_bounds = array<i64: 1, 256>}, {pipeline_mode = #tpu.pipeline_mode<synchronous>, transform_indices = @transform_3, window_bounds = array<i64: 256, 256>}, {pipeline_mode = #tpu.pipeline_mode<synchronous>, transform_indices = @transform_4, window_bounds = array<i64: 1, 256>}, {pipeline_mode = #tpu.pipeline_mode<synchronous>, transform_indices = @transform_5, window_bounds = array<i64: 256, 128>}, {pipeline_mode = #tpu.pipeline_mode<synchronous>, transform_indices = @transform_6, window_bounds = array<i64: 1, 128>}, {transform_indices = @transform_7, window_bounds = array<i64: 8, 128>}]} {
    %c0 = arith.constant 0 : index
    %c0_0 = arith.constant 0 : index
    %0 = vector.load %arg1[%c0, %c0_0] : memref<8x16xf32, #tpu.memory_space<vmem>>, vector<8x16xf32>
    %1 = arith.truncf %0 : vector<8x16xf32> to vector<8x16xbf16>
    %c0_1 = arith.constant 0 : index
    %c0_2 = arith.constant 0 : index
    %2 = vector.load %arg2[%c0_1, %c0_2] : memref<16x256xbf16, #tpu.memory_space<vmem>>, vector<16x256xbf16>
    %cst = arith.constant dense<0.000000e+00> : vector<8x256xf32>
    %3 = tpu.matmul %1, %2, %cst {dimension_numbers = #tpu.dot_dimension_numbers<[1], [0], [0], [1], [0, 0, 1, 1], [], []>} : vector<8x16xbf16>, vector<16x256xbf16>, vector<8x256xf32> -> vector<8x256xf32>
    %c0_3 = arith.constant 0 : index
    %c0_4 = arith.constant 0 : index
    %4 = vector.load %arg3[%c0_3, %c0_4] : memref<1x256xf32, #tpu.memory_space<vmem>>, vector<1x256xf32>
    %5 = vector.broadcast %4 : vector<1x256xf32> to vector<8x256xf32>
    %6 = arith.addf %3, %5 : vector<8x256xf32>
    %cst_5 = arith.constant 0.000000e+00 : f32
    %7 = vector.broadcast %cst_5 : f32 to vector<8x256xf32>
    %8 = arith.maximumf %6, %7 : vector<8x256xf32>
    %9 = arith.truncf %8 : vector<8x256xf32> to vector<8x256xbf16>
    %c0_6 = arith.constant 0 : index
    %c0_7 = arith.constant 0 : index
    %10 = vector.load %arg4[%c0_6, %c0_7] : memref<256x256xbf16, #tpu.memory_space<vmem>>, vector<256x256xbf16>
    %cst_8 = arith.constant dense<0.000000e+00> : vector<8x256xf32>
    %11 = tpu.matmul %9, %10, %cst_8 {dimension_numbers = #tpu.dot_dimension_numbers<[1], [0], [0], [1], [0, 0, 1, 1], [], []>} : vector<8x256xbf16>, vector<256x256xbf16>, vector<8x256xf32> -> vector<8x256xf32>
    %c0_9 = arith.constant 0 : index
    %c0_10 = arith.constant 0 : index
    %12 = vector.load %arg5[%c0_9, %c0_10] : memref<1x256xf32, #tpu.memory_space<vmem>>, vector<1x256xf32>
    %13 = vector.broadcast %12 : vector<1x256xf32> to vector<8x256xf32>
    %14 = arith.addf %11, %13 : vector<8x256xf32>
    %cst_11 = arith.constant 0.000000e+00 : f32
    %15 = vector.broadcast %cst_11 : f32 to vector<8x256xf32>
    %16 = arith.maximumf %14, %15 : vector<8x256xf32>
    %17 = arith.truncf %16 : vector<8x256xf32> to vector<8x256xbf16>
    %c0_12 = arith.constant 0 : index
    %c0_13 = arith.constant 0 : index
    %18 = vector.load %arg6[%c0_12, %c0_13] : memref<256x128xbf16, #tpu.memory_space<vmem>>, vector<256x128xbf16>
    %cst_14 = arith.constant dense<0.000000e+00> : vector<8x128xf32>
    %19 = tpu.matmul %17, %18, %cst_14 {dimension_numbers = #tpu.dot_dimension_numbers<[1], [0], [0], [1], [0, 0, 1, 1], [], []>} : vector<8x256xbf16>, vector<256x128xbf16>, vector<8x128xf32> -> vector<8x128xf32>
    %c0_15 = arith.constant 0 : index
    %c0_16 = arith.constant 0 : index
    %20 = vector.load %arg7[%c0_15, %c0_16] : memref<1x128xf32, #tpu.memory_space<vmem>>, vector<1x128xf32>
    %21 = vector.broadcast %20 : vector<1x128xf32> to vector<8x128xf32>
    %22 = arith.addf %19, %21 : vector<8x128xf32>
    %23 = tpu.iota {dimensions = array<i32: 1>} : vector<8x128xi32>
    %c8_i32 = arith.constant 8 : i32
    %24 = vector.broadcast %c8_i32 : i32 to vector<8x128xi32>
    %25 = arith.cmpi slt, %23, %24 : vector<8x128xi32>
    %cst_17 = arith.constant 0xFF800000 : f32
    %26 = vector.broadcast %cst_17 : f32 to vector<8x128xf32>
    %27 = arith.select %25, %22, %26 : vector<8x128xi1>, vector<8x128xf32>
    %cst_18 = arith.constant dense<0xFF800000> : vector<8xf32>
    %28 = vector.multi_reduction <maximumf>, %27, %cst_18 [1] : vector<8x128xf32> to vector<8xf32>
    %29 = vector.shape_cast %28 : vector<8xf32> to vector<8x1xf32>
    %30 = vector.broadcast %29 : vector<8x1xf32> to vector<8x128xf32>
    %31 = arith.subf %27, %30 : vector<8x128xf32>
    %32 = math.exp %31 : vector<8x128xf32>
    %cst_19 = arith.constant dense<0.000000e+00> : vector<8xf32>
    %33 = vector.multi_reduction <add>, %32, %cst_19 [1] : vector<8x128xf32> to vector<8xf32>
    %34 = vector.shape_cast %33 : vector<8xf32> to vector<8x1xf32>
    %35 = tpu.reciprocal %34 {approx = true} : vector<8x1xf32> -> vector<8x1xf32>
    %36 = arith.mulf %34, %35 : vector<8x1xf32>
    %cst_20 = arith.constant 2.000000e+00 : f32
    %37 = vector.broadcast %cst_20 : f32 to vector<8x1xf32>
    %38 = arith.subf %37, %36 : vector<8x1xf32>
    %39 = arith.mulf %35, %38 : vector<8x1xf32>
    %40 = vector.broadcast %39 : vector<8x1xf32> to vector<8x128xf32>
    %41 = arith.mulf %32, %40 : vector<8x128xf32>
    %c8_i32_21 = arith.constant 8 : i32
    %42 = vector.broadcast %c8_i32_21 : i32 to vector<8x128xi32>
    %43 = arith.cmpi eq, %23, %42 : vector<8x128xi32>
    %cst_22 = arith.constant 0.000000e+00 : f32
    %44 = vector.broadcast %cst_22 : f32 to vector<8x128xf32>
    %45 = arith.select %43, %22, %44 : vector<8x128xi1>, vector<8x128xf32>
    %46 = arith.select %25, %41, %45 : vector<8x128xi1>, vector<8x128xf32>
    %c0_23 = arith.constant 0 : index
    %c0_24 = arith.constant 0 : index
    %47 = vector.load %arg8[%c0_23, %c0_24] : memref<8x128xf32, #tpu.memory_space<vmem>>, vector<8x128xf32>
    tpu.vector_store %arg8[%c0_23, %c0_24], %46 {strides = array<i32>} : memref<8x128xf32, #tpu.memory_space<vmem>>, vector<8x128xf32>,
    return
  }
  func.func @transform_0(%arg0: i32) -> (i32, i32) {
    %c0_i32 = arith.constant 0 : i32
    %c0_i32_0 = arith.constant 0 : i32
    return %arg0, %c0_i32 : i32, i32
  }
  func.func @transform_1(%arg0: i32) -> (i32, i32) {
    %c0_i32 = arith.constant 0 : i32
    %c0_i32_0 = arith.constant 0 : i32
    %c0_i32_1 = arith.constant 0 : i32
    return %c0_i32, %c0_i32_0 : i32, i32
  }
  func.func @transform_2(%arg0: i32) -> (i32, i32) {
    %c0_i32 = arith.constant 0 : i32
    %c0_i32_0 = arith.constant 0 : i32
    %c0_i32_1 = arith.constant 0 : i32
    return %c0_i32, %c0_i32_0 : i32, i32
  }
  func.func @transform_3(%arg0: i32) -> (i32, i32) {
    %c0_i32 = arith.constant 0 : i32
    %c0_i32_0 = arith.constant 0 : i32
    %c0_i32_1 = arith.constant 0 : i32
    return %c0_i32, %c0_i32_0 : i32, i32
  }
  func.func @transform_4(%arg0: i32) -> (i32, i32) {
    %c0_i32 = arith.constant 0 : i32
    %c0_i32_0 = arith.constant 0 : i32
    %c0_i32_1 = arith.constant 0 : i32
    return %c0_i32, %c0_i32_0 : i32, i32
  }
  func.func @transform_5(%arg0: i32) -> (i32, i32) {
    %c0_i32 = arith.constant 0 : i32
    %c0_i32_0 = arith.constant 0 : i32
    %c0_i32_1 = arith.constant 0 : i32
    return %c0_i32, %c0_i32_0 : i32, i32
  }
  func.func @transform_6(%arg0: i32) -> (i32, i32) {
    %c0_i32 = arith.constant 0 : i32
    %c0_i32_0 = arith.constant 0 : i32
    %c0_i32_1 = arith.constant 0 : i32
    return %c0_i32, %c0_i32_0 : i32, i32
  }
  func.func @transform_7(%arg0: i32) -> (i32, i32) {
    %c0_i32 = arith.constant 0 : i32
    %c0_i32_0 = arith.constant 0 : i32
    return %arg0, %c0_i32 : i32, i32
  }
}

</mosaic_0001>

<bundles_post_ra>
// kernel: tpu_custom_call.1
= control target key start
LH: loop header
LB: loop body
LE: loop exit
PB: predicated region body
PF: predicated region fallthrough
CT: control target
= control target key end

     0   :  { %12 = vsyncpa [#allocation3], 0  ;;  %s1017_s0 = inlined_call_operand.hbm [shape: f32[8,16], index: 0, kind: input, shape index: {}]   ;;  %s1018_s1 = inlined_call_operand.hbm [shape: bf16[16,256], index: 1, kind: input, shape index: {}]   ;;  %s1019_s2 = inlined_call_operand.vmem [shape: f32[1,256], index: 2, kind: input, shape index: {}]   ;;  %s1020_s3 = inlined_call_operand.hbm [shape: bf16[256,256], index: 3, kind: input, shape index: {}]   ;;  %s1021_s4 = inlined_call_operand.vmem [shape: f32[1,256], index: 4, kind: input, shape index: {}]   ;;  %s1022_s5 = inlined_call_operand.hbm [shape: bf16[256,128], index: 5, kind: input, shape index: {}]   ;;  %s1023_s6 = inlined_call_operand.vmem [shape: f32[1,128], index: 6, kind: input, shape index: {}]   ;;  %s1024_s7 = inlined_call_operand.hbm [shape: f32[8,128], index: 7, kind: output, shape index: {}]  }
   0x1   :  { %13 = vsyncpa [#allocation6], 0 }
   0x2   :  { %14 = vsyncpa [#allocation9], 0 }
   0x3   :  { %15 = vsyncpa [#allocation4], 0  ;;  %s890_s24 = smov [#allocation5]   ;;  %s772_s28 = scalar_lea.hbm %s1018_s1, 256 }
   0x4   :  { %s31_s25 = sshll.u32 %s890_s24, 4  ;;  %p773_p0 = scmp.ne.s32.totalorder %s1018_s1, %s772_s28  ;;  %s32_s25 = int_to_ptr.vmem [resolvable:$true] %s31_s25 }
   0x5   :  { %p776_p1 = scmp.lt.u32.totalorder %s772_s28, %s1018_s1 }
   0x7   :  { %p778_p2 = pnand %p776_p1, %p773_p0 }
   0x9   :  { %781 = shalt.err (!%p778_p2)
}
   0xa   :  { %s782_s10 = scalar_lea.vmem %s32_s25, 256  ;;  %p787_p4 = scmp.lt.s32.totalorder %s32_s25, %s32_s25 }
   0xb   :  { %p783_p3 = scmp.ne.s32.totalorder %s32_s25, %s782_s10  ;;  %p788_p5 = scmp.lt.s32.totalorder %s782_s10, %s782_s10 }
   0xd   :  { %p789_p6 = por %p788_p5, %p787_p4 }
   0xf   :  { %p790_p7 = pnand %p789_p6, %p783_p3 }
  0x11   :  { %793 = shalt.err (!%p790_p7)
}
  0x12   :  { %s891_s11 = smov 128   ;;  %s892_s12 = smov 8  }
  0x13   :  { %37 = dma.hbm_to_vmem [thread:$0]  %s1018_s1, 256, %s32_s25, [#allocation6], %s891_s11, %s891_s11, %s892_s12  }
  0x14   :  { %s893_s15 = smov [#allocation2]   ;;  %s894_s17 = smov [#allocation7]  }
  0x15   :  { %s22_s16 = sshll.u32 %s893_s15, 4  ;;  %s45_s18 = sshll.u32 %s894_s17, 4  ;;  %s23_s16 = int_to_ptr.vmem [resolvable:$true] %s22_s16  ;;  %s46_s18 = int_to_ptr.vmem [resolvable:$true] %s45_s18 }
  0x16   :  { %s794_s21 = scalar_lea.hbm %s1017_s0, 128 }
  0x17   :  { %p795_p8 = scmp.ne.s32.totalorder %s1017_s0, %s794_s21  ;;  %p798_p9 = scmp.lt.u32.totalorder %s794_s21, %s1017_s0 }
  0x19   :  { %p800_p10 = pnand %p798_p9, %p795_p8 }
  0x1b   :  { %803 = shalt.err (!%p800_p10)
}
  0x1c   :  { %s804_s1 = scalar_lea.vmem %s23_s16, 128  ;;  %p809_p12 = scmp.lt.s32.totalorder %s23_s16, %s23_s16 }
  0x1d   :  { %p805_p11 = scmp.ne.s32.totalorder %s23_s16, %s804_s1  ;;  %p810_p13 = scmp.lt.s32.totalorder %s804_s1, %s804_s1 }
  0x1f   :  { %p811_p0 = por %p810_p13, %p809_p12 }
  0x21   :  { %p812_p1 = pnand %p811_p0, %p805_p11 }
  0x23   :  { %815 = shalt.err (!%p812_p1)
}
  0x24   :  { %25 = dma.hbm_to_vmem [thread:$0]  %s1017_s0, 128, %s23_s16, [#allocation3]  }
  0x25   :  { %s816_s30 = scalar_lea.hbm %s1020_s3, 4096 }
  0x26   :  { %p817_p2 = scmp.ne.s32.totalorder %s1020_s3, %s816_s30  ;;  %p820_p3 = scmp.lt.u32.totalorder %s816_s30, %s1020_s3 }
  0x28   :  { %p822_p4 = pnand %p820_p3, %p817_p2 }
  0x2a   :  { %825 = shalt.err (!%p822_p4)
}
  0x2b   :  { %s826_s14 = scalar_lea.vmem %s46_s18, 4096  ;;  %p831_p6 = scmp.lt.s32.totalorder %s46_s18, %s46_s18 }
  0x2c   :  { %p827_p5 = scmp.ne.s32.totalorder %s46_s18, %s826_s14  ;;  %p832_p7 = scmp.lt.s32.totalorder %s826_s14, %s826_s14 }
  0x2e   :  { %p833_p8 = por %p832_p7, %p831_p6 }
  0x30   :  { %p834_p9 = pnand %p833_p8, %p827_p5 }
  0x32   :  { %837 = shalt.err (!%p834_p9)
}
  0x33   :  { %51 = dma.hbm_to_vmem [thread:$0]  %s1020_s3, 4096, %s46_s18, [#allocation6], %s891_s11, %s891_s11, %s892_s12  }
  0x34   :  { %s895_s16 = smov [#allocation8]   ;;  %s838_s21 = scalar_lea.hbm %s1022_s5, 2048 }
  0x35   :  { %s59_s17 = sshll.u32 %s895_s16, 4  ;;  %p839_p10 = scmp.ne.s32.totalorder %s1022_s5, %s838_s21  ;;  %s60_s17 = int_to_ptr.vmem [resolvable:$true] %s59_s17 }
  0x36   :  { %p842_p11 = scmp.lt.u32.totalorder %s838_s21, %s1022_s5 }
  0x38   :  { %p844_p12 = pnand %p842_p11, %p839_p10 }
  0x3a   :  { %847 = shalt.err (!%p844_p12)
}
  0x3b   :  { %s848_s1 = scalar_lea.vmem %s60_s17, 2048  ;;  %p853_p0 = scmp.lt.s32.totalorder %s60_s17, %s60_s17 }
  0x3c   :  { %p849_p13 = scmp.ne.s32.totalorder %s60_s17, %s848_s1  ;;  %p854_p1 = scmp.lt.s32.totalorder %s848_s1, %s848_s1 }
  0x3e   :  { %p855_p2 = por %p854_p1, %p853_p0 }
  0x40   :  { %p856_p3 = pnand %p855_p2, %p849_p13 }
  0x42   :  { %859 = shalt.err (!%p856_p3)
}
  0x43   :  { %s896_s3 = smov 64   ;;  %s897_s11 = smov 4  }
  0x44   :  { %65 = dma.hbm_to_vmem [thread:$0]  %s1022_s5, 2048, %s60_s17, [#allocation9], %s896_s3, %s896_s3, %s897_s11  }
  0x45   :  { %882 = dma.done.wait [#allocation3], 128  }
  0x46   :  { %883 = vsyncadd [#allocation3], 4294967168 }
  0x47   :  { %884 = dma.done.wait [#allocation6], 4352  }
  0x48   :  { %885 = vsyncadd [#allocation6], 4294962944 }
  0x49   :  { %886 = dma.done.wait [#allocation9], 2048  }
  0x4a   :  { %887 = vsyncadd [#allocation9], 4294965248  ;;  %v898_v0 = vmov 0   ;;  %v701_v1 = vld [vmem:[#allocation5 + $0x4] ss:$8 sps:$4 sm:$0xff]   ;;  %v81_v3 = vld [vmem:[#allocation2] sm:$0xff]  ;;  %v87_v49 = vlaneseq }
  0x4b   :  { %143 = vmatprep.mubr.bf16.mxu0 %v898_v0  ;;  %v703_v2 = vld [vmem:[#allocation5] ss:$8 sps:$4 sm:$0xff]   ;;  %111 = vmatprep.subr.bf16.mxu0 %v701_v1  ;;  %v82_v4 = vpack.c.bf16 %v81_v3, %v81_v3  ;;  %v704_v5 = vld [vmem:[#allocation7 + $0x4] ss:$8 sps:$4 sm:$0xff]   ;;  %v706_v6 = vld [vmem:[#allocation7] ss:$8 sps:$4 sm:$0xff]  }
  0x4c   :  { %112 = vmatpush1.bf16.msra.mxu0 %v703_v2  ;;  %vm107_vm0 = vcmask 130048   ;;  %v707_v7 = vld [vmem:[#allocation7 + $0x14] ss:$8 sps:$4 sm:$0xff]   ;;  %360 = vmatprep.subr.bf16.mxu1 %v704_v5  ;;  %v709_v8 = vld [vmem:[#allocation7 + $0x10] ss:$8 sps:$4 sm:$0xff]   ;;  %v752_v37 = vld [vmem:[#allocation8 + $0x40] sm:$0xff]  }
  0x4d   :  { %361 = vmatpush1.bf16.msra.mxu1 %v706_v6  ;;  %v710_v9 = vld [vmem:[#allocation7 + $0x24] ss:$8 sps:$4 sm:$0xff]   ;;  %v712_v10 = vld [vmem:[#allocation7 + $0x20] ss:$8 sps:$4 sm:$0xff]   ;;  %v713_v11 = vld [vmem:[#allocation7 + $0x34] ss:$8 sps:$4 sm:$0xff]   ;;  %669 = vmatprep.subr.bf16.mxu0 %v752_v37 }
  0x4e   :  { %362 = vmatprep.subr.bf16.mxu1 %v707_v7  ;;  %v715_v12 = vld [vmem:[#allocation7 + $0x30] ss:$8 sps:$4 sm:$0xff]   ;;  %v716_v13 = vld [vmem:[#allocation7 + $0x44] ss:$8 sps:$4 sm:$0xff]   ;;  %v718_v14 = vld [vmem:[#allocation7 + $0x40] ss:$8 sps:$4 sm:$0xff]  }
  0x4f   :  { %619 = vmatmul.mubr.msk.bf16.vlgmr.msra.gmra.mrb[0].mxu0 %vm107_vm0, %v82_v4  ;;  %v719_v15 = vld [vmem:[#allocation7 + $0x54] ss:$8 sps:$4 sm:$0xff]   ;;  %v721_v16 = vld [vmem:[#allocation7 + $0x50] ss:$8 sps:$4 sm:$0xff]   ;;  %v722_v17 = vld [vmem:[#allocation7 + $0x64] ss:$8 sps:$4 sm:$0xff]  }
  0x50   :  { %v724_v18 = vld [vmem:[#allocation7 + $0x60] ss:$8 sps:$4 sm:$0xff]   ;;  %v725_v19 = vld [vmem:[#allocation7 + $0x74] ss:$8 sps:$4 sm:$0xff]   ;;  %v727_v20 = vld [vmem:[#allocation7 + $0x70] ss:$8 sps:$4 sm:$0xff]  }
  0x51   :  { %363 = vmatpush1.bf16.msra.mxu1 %v709_v8  ;;  %v728_v21 = vld [vmem:[#allocation7 + $0x84] ss:$8 sps:$4 sm:$0xff]   ;;  %v730_v22 = vld [vmem:[#allocation7 + $0x80] ss:$8 sps:$4 sm:$0xff]   ;;  %v731_v23 = vld [vmem:[#allocation7 + $0x94] ss:$8 sps:$4 sm:$0xff]  }
  0x52   :  { %364 = vmatprep.subr.bf16.mxu1 %v710_v9  ;;  %v733_v24 = vld [vmem:[#allocation7 + $0x90] ss:$8 sps:$4 sm:$0xff]   ;;  %v734_v25 = vld [vmem:[#allocation7 + $0xa4] ss:$8 sps:$4 sm:$0xff]   ;;  %v736_v26 = vld [vmem:[#allocation7 + $0xa0] ss:$8 sps:$4 sm:$0xff]  }
  0x53   :  { %v737_v27 = vld [vmem:[#allocation7 + $0xb4] ss:$8 sps:$4 sm:$0xff]   ;;  %v739_v28 = vld [vmem:[#allocation7 + $0xb0] ss:$8 sps:$4 sm:$0xff]   ;;  %v740_v29 = vld [vmem:[#allocation7 + $0xc4] ss:$8 sps:$4 sm:$0xff]  }
  0x54   :  { %v742_v30 = vld [vmem:[#allocation7 + $0xc0] ss:$8 sps:$4 sm:$0xff]   ;;  %v743_v31 = vld [vmem:[#allocation7 + $0xd4] ss:$8 sps:$4 sm:$0xff]   ;;  %v745_v32 = vld [vmem:[#allocation7 + $0xd0] ss:$8 sps:$4 sm:$0xff]  }
  0x55   :  { %365 = vmatpush1.bf16.msra.mxu1 %v712_v10  ;;  %v746_v33 = vld [vmem:[#allocation7 + $0xe4] ss:$8 sps:$4 sm:$0xff]   ;;  %v748_v34 = vld [vmem:[#allocation7 + $0xe0] ss:$8 sps:$4 sm:$0xff]   ;;  %v749_v35 = vld [vmem:[#allocation7 + $0xf4] ss:$8 sps:$4 sm:$0xff]  }
  0x56   :  { %366 = vmatprep.subr.bf16.mxu1 %v713_v11  ;;  %v751_v36 = vld [vmem:[#allocation7 + $0xf0] ss:$8 sps:$4 sm:$0xff]   ;;  %v753_v38 = vld [vmem:[#allocation8] sm:$0xff]   ;;  %v754_v39 = vld [vmem:[#allocation8 + $0x48] sm:$0xff]   ;;  %v88_v50 = vshrl.u32 %v87_v49, 7 }
  0x57   :  { %670 = vmatpush3.bf16.msra.mxu0 %v753_v38  ;;  %v755_v40 = vld [vmem:[#allocation8 + $0x8] sm:$0xff]   ;;  %v756_v41 = vld [vmem:[#allocation8 + $0x50] sm:$0xff]   ;;  %v758_v43 = vld [vmem:[#allocation8 + $0x58] sm:$0xff]  }
  0x58   :  { %671 = vmatprep.subr.bf16.mxu0 %v754_v39  ;;  %v757_v42 = vld [vmem:[#allocation8 + $0x10] sm:$0xff]   ;;  %v759_v44 = vld [vmem:[#allocation8 + $0x18] sm:$0xff]   ;;  %v760_v45 = vld [vmem:[#allocation8 + $0x60] sm:$0xff]   ;;  %v89_v51 = vsub.s32 0, %v88_v50  ;;  %v93_v53 = vsub.s32 1, %v88_v50 }
  0x59   :  { %367 = vmatpush1.bf16.msra.mxu1 %v715_v12  ;;  %v761_v46 = vld [vmem:[#allocation8 + $0x20] sm:$0xff]   ;;  %v762_v47 = vld [vmem:[#allocation8 + $0x68] sm:$0xff]   ;;  %v764_v2 = vld [vmem:[#allocation8 + $0x70] sm:$0xff]  }
  0x5a   :  { %368 = vmatprep.subr.bf16.mxu1 %v716_v13  ;;  %v763_v48 = vld [vmem:[#allocation8 + $0x28] sm:$0xff]   ;;  %v765_v3 = vld [vmem:[#allocation8 + $0x30] sm:$0xff]   ;;  %v766_v4 = vld [vmem:[#allocation8 + $0x78] sm:$0xff]  }
  0x5b   :  { %672 = vmatpush3.bf16.msra.mxu0 %v755_v40  ;;  %v85_v52 = vld [vmem:[%s1019_s2] sm:$0x3]  ;;  %v767_v5 = vld [vmem:[#allocation8 + $0x38] sm:$0xff]  }
  0x5c   :  { %673 = vmatprep.subr.bf16.mxu0 %v756_v41  ;;  %v90_v54 = vrot.slane %v85_v52, %v89_v51  ;;  %v94_v55 = vrot.slane %v85_v52, %v93_v53  ;;  %v188_v6 = vld [vmem:[%s1021_s4] sm:$0x3]  ;;  %s899_s4 = smov [#allocation10]  }
  0x5d   :  { %369 = vmatpush1.bf16.msra.mxu1 %v718_v14  ;;  %v193_v7 = vrot.slane %v188_v6, %v89_v51  ;;  %v197_v8 = vrot.slane %v188_v6, %v93_v53 }
  0x5e   :  { %370 = vmatprep.subr.bf16.mxu1 %v719_v15 }
  0x5f   :  { %674 = vmatpush3.bf16.msra.mxu0 %v757_v42 }
  0x60   :  { %675 = vmatprep.subr.bf16.mxu0 %v758_v43 }
  0x61   :  { %371 = vmatpush1.bf16.msra.mxu1 %v721_v16 }
  0x62   :  { %372 = vmatprep.subr.bf16.mxu1 %v722_v17 }
  0x63   :  { %676 = vmatpush3.bf16.msra.mxu0 %v759_v44 }
  0x64   :  { %677 = vmatprep.subr.bf16.mxu0 %v760_v45 }
  0x65   :  { %373 = vmatpush1.bf16.msra.mxu1 %v724_v18 }
  0x66   :  { %374 = vmatprep.subr.bf16.mxu1 %v725_v19  ;;  %v581_v19 = vand.u32 127, %v87_v49 }
  0x67   :  { %678 = vmatpush3.bf16.msra.mxu0 %v761_v46 }
  0x68   :  { %679 = vmatprep.subr.bf16.mxu0 %v762_v47  ;;  %vm582_vm1 = vcmp.lt.s32.totalorder %v581_v19, 8  ;;  %vm596_vm2 = vcmp.eq.s32.totalorder %v581_v19, 8 }
  0x69   :  { %375 = vmatpush1.bf16.msra.mxu1 %v727_v20 }
  0x6a   :  { %376 = vmatprep.subr.bf16.mxu1 %v728_v21 }
  0x6b   :  { %680 = vmatpush3.bf16.msra.mxu0 %v763_v48 }
  0x6c   :  { %681 = vmatprep.subr.bf16.mxu0 %v764_v2 }
  0x6d   :  { %377 = vmatpush1.bf16.msra.mxu1 %v730_v22  ;;  %v652_v22 = vld [vmem:[%s1023_s6] ss:$0 sm:$0xff]  ;;  %s606_s6 = sshll.u32 %s899_s4, 4  ;;  %s607_s6 = int_to_ptr.vmem [resolvable:$true] %s606_s6 }
  0x6e   :  { %378 = vmatprep.subr.bf16.mxu1 %v731_v23  ;;  %s860_s30 = scalar_lea.vmem %s607_s6, 128  ;;  %p865_p5 = scmp.lt.s32.totalorder %s607_s6, %s607_s6 }
  0x6f   :  { %682 = vmatpush3.bf16.msra.mxu0 %v765_v3  ;;  %p861_p4 = scmp.ne.s32.totalorder %s607_s6, %s860_s30  ;;  %p866_p6 = scmp.lt.s32.totalorder %s860_s30, %s860_s30 }
  0x70   :  { %683 = vmatprep.subr.bf16.mxu0 %v766_v4 }
  0x71   :  { %379 = vmatpush1.bf16.msra.mxu1 %v733_v24  ;;  %p867_p7 = por %p866_p6, %p865_p5 }
  0x72   :  { %380 = vmatprep.subr.bf16.mxu1 %v734_v25 }
  0x73   :  { %684 = vmatpush3.bf16.msra.mxu0 %v767_v5  ;;  %p868_p8 = pnand %p867_p7, %p861_p4 }
  0x75   :  { %381 = vmatpush1.bf16.msra.mxu1 %v736_v26 }
  0x76   :  { %382 = vmatprep.subr.bf16.mxu1 %v737_v27 }
  0x79   :  { %383 = vmatpush1.bf16.msra.mxu1 %v739_v28 }
  0x7a   :  { %384 = vmatprep.subr.bf16.mxu1 %v740_v29 }
  0x7d   :  { %385 = vmatpush1.bf16.msra.mxu1 %v742_v30 }
  0x7e   :  { %386 = vmatprep.subr.bf16.mxu1 %v743_v31 }
  0x81   :  { %387 = vmatpush1.bf16.msra.mxu1 %v745_v32 }
  0x82   :  { %388 = vmatprep.subr.bf16.mxu1 %v746_v33 }
  0x85   :  { %389 = vmatpush1.bf16.msra.mxu1 %v748_v34 }
  0x86   :  { %390 = vmatprep.subr.bf16.mxu1 %v749_v35 }
  0x89   :  { %391 = vmatpush1.bf16.msra.mxu1 %v751_v36 }
 0x122   :  { %v145_v56 = vpop.f32.mrb[0].mxu0 }
 0x123   :  { %v146_v57 = vadd.f32 %v145_v56, %v90_v54  ;;  %v147_v58 = vpop.f32.mrb[1].mxu0 }
 0x124   :  { %v148_v59 = vadd.f32 %v147_v58, %v94_v55  ;;  %v149_v60 = vpop.f32.mrb[2].mxu0 }
 0x125   :  { %v152_v61 = vmax.f32 %v146_v57, 0.0  ;;  %v150_v62 = vpop.f32.mrb[3].mxu0 }
 0x126   :  { %v153_v63 = vmax.f32 %v148_v59, 0.0 }
 0x127   :  { %v154_v1 = vpack.c.bf16 %v152_v61, %v152_v61 }
 0x128   :  { %v155_v0 = vpack.c.bf16 %v153_v63, %v153_v63 }
 0x12a   :  { %392 = vmatprep.mubr.bf16.mxu1 %v155_v0 }
 0x12b   :  { %393 = vmatmul.mubr.bf16.vlgmr.msra.gmra.mrb[0].mxu1 %v154_v1 }
 0x1fe   :  { %v394_v9 = vpop.f32.mrb[0].mxu1 }
 0x1ff   :  { %v395_v10 = vadd.f32 %v394_v9, %v193_v7  ;;  %v396_v11 = vpop.f32.mrb[1].mxu1 }
 0x200   :  { %v397_v12 = vadd.f32 %v396_v11, %v197_v8  ;;  %v398_v13 = vpop.f32.mrb[2].mxu1 }
 0x201   :  { %v401_v14 = vmax.f32 %v395_v10, 0.0  ;;  %v399_v15 = vpop.f32.mrb[3].mxu1 }
 0x202   :  { %v402_v16 = vmax.f32 %v397_v12, 0.0 }
 0x203   :  { %v403_v18 = vpack.c.bf16 %v401_v14, %v401_v14 }
 0x204   :  { %v404_v17 = vpack.c.bf16 %v402_v16, %v402_v16 }
 0x206   :  { %572 = vmatprep.mubr.bf16.mxu0 %v404_v17 }
 0x207   :  { %573 = vmatmul.mubr.bf16.vlgmr.msra.gmra.mrb[4].mxu0 %v403_v18 }
 0x2da   :  { %v685_v20 = vpop.f32.mrb[4].mxu0 }
 0x2db   :  { %v686_v21 = vpop.f32.mrb[5].mxu0 }
 0x2dc   :  { %v687_v23 = vadd.f32 %v686_v21, %v685_v20  ;;  %v688_v24 = vpop.f32.mrb[6].mxu0 }
 0x2dd   :  { %v689_v25 = vpop.f32.mrb[7].mxu0 }
 0x2de   :  { %v575_v26 = vadd.f32 %v687_v23, %v652_v22 }
 0x2e0   :  { %v583_v27 = vsel %vm582_vm1, %v575_v26, -inf  ;;  %v597_v28 = vsel %vm596_vm2, %v575_v26, 0.0 }
 0x2e1   :  { %584 = vmax.xlane.f32.xlu0 %v583_v27 }
 0x36e   :  { %v585_v29 = vpop.xlane.xlu0 %584 }
 0x36f   :  { %v586_v30 = vsub.f32 %v583_v27, %v585_v29 }
 0x371   :  { %v587_v31 = vmul.f32 1.442695, %v586_v30 }
 0x373   :  { %768 = vpow2.f32 %v587_v31 }
 0x37d   :  { %v769_v32 = vpop.eup %768 }
 0x37e   :  { %589 = vadd.xlane.f32.xlu0 %v769_v32 }
 0x40b   :  { %v590_v33 = vpop.xlane.xlu0 %589 }
 0x40c   :  { %770 = vrcp.f32 %v590_v33 }
 0x416   :  { %v771_v34 = vpop.eup %770 }
 0x417   :  { %v592_v35 = vmul.f32 %v771_v34, %v590_v33 }
 0x419   :  { %v593_v36 = vsub.f32 2.0, %v592_v35 }
 0x41b   :  { %v594_v37 = vmul.f32 %v771_v34, %v593_v36 }
 0x41d   :  { %v595_v38 = vmul.f32 %v769_v32, %v594_v37 }
 0x41f   :  { %v598_v39 = vsel %vm582_vm1, %v595_v38, %v597_v28 }
 0x420   :  { %599 = vst [vmem:[#allocation10] sm:$0xff] %v598_v39 }
 0x421   :  { %871 = shalt.err (!%p868_p8)
}
 0x422   :  { %s872_s10 = scalar_lea.hbm %s1024_s7, 128 }
 0x423   :  { %p873_p9 = scmp.ne.s32.totalorder %s1024_s7, %s872_s10  ;;  %p876_p10 = scmp.lt.u32.totalorder %s872_s10, %s1024_s7 }
 0x425   :  { %p878_p11 = pnand %p876_p10, %p873_p9 }
 0x427   :  { %881 = shalt.err (!%p878_p11)
}
 0x428   :  { %609 = dma.vmem_to_hbm [thread:$0]  %s607_s6, 128, %s1024_s7, [#allocation4]  }
 0x429   :  { %888 = dma.done.wait [#allocation4], 128  }
 0x42a   :  { %889 = vsyncadd [#allocation4], 4294967168 }
 0x42b   :  { %613 = vsyncpa [#allocation3], 1 }
 0x42c   :  { %614 = vsyncpa [#allocation6], 1 }
 0x42d   :  { %615 = vsyncpa [#allocation9], 1 }
 0x42e   :  { %616 = vsyncpa [#allocation4], 1 }

</bundles_post_ra>
